<compile_context>
chip_gen: v7x
topology: tpu7x:2x2x1
jax: 0.10.0
libtpu: 0.0.40
codegen_flags: <defaults>
</compile_context>

<pallas_src>
import jax
import jax.numpy as jnp
from jax.experimental import pallas as pl
from jax.experimental.pallas import tpu as pltpu  # noqa: F401  (TPU backend)

# Model config: torch.nn.ConvTranspose2d(5, 5, kernel_size=3, stride=2,
#                                        padding=3, output_padding=2)
CI, CO = 5, 5
KH, KW = 3, 3
STRIDE = 2
PAD = 3
OUT_PAD = 2

# GEMM dims padded to hardware-friendly tiles.
K_RAW = KH * KW * CI            # 45
K_PAD = 48                      # next multiple of 8 (sublane)
CO_PAD = 8                      # sublane-aligned output rows


def _convt_gemm_kernel(w_ref, cols_ref, b_ref, o_ref):
    # w_ref:    (CO_PAD, K_PAD)   W^T, spatially flipped transposed-conv weights
    # cols_ref: (K_PAD, M_PAD)    cols^T, im2col patches (lane-dense M = OH*OW)
    # b_ref:    (CO_PAD, 1)       bias, broadcast along lanes
    # o_ref:    (CO_PAD, M_PAD)
    acc = jnp.dot(w_ref[...], cols_ref[...], preferred_element_type=jnp.float32)
    acc = acc + b_ref[...]
    # ReLU; identical to where(x>0, x, x*0.0) for finite activations.
    o_ref[...] = jnp.maximum(acc, 0.0)


def conv_transpose_relu(x_nchw, weight, bias):
    """Equivalent of Model.forward(x1) for x1 of shape (1, CI, H, W), NCHW."""
    n, ci, hin, win = x_nchw.shape
    assert n == 1 and ci == CI
    hout = (hin - 1) * STRIDE - 2 * PAD + KH + OUT_PAD
    wout = (win - 1) * STRIDE - 2 * PAD + KW + OUT_PAD
    m_raw = hout * wout
    m_pad = pl.cdiv(m_raw, 128) * 128        # 841 -> 896 (lane-dense)

    x = x_nchw[0]                            # (CI, Hin, Win)

    # Zero-stuff the input (stride insertion).
    hup = (hin - 1) * STRIDE + 1
    wup = (win - 1) * STRIDE + 1
    x_up = jnp.zeros((CI, hup, wup), x.dtype).at[:, ::STRIDE, ::STRIDE].set(x)

    # Equivalent forward conv has padding KH-1-PAD = -1 (crop 1 at top/left);
    # output_padding adds zeros at the bottom/right.  Padded size = hout+KH-1.
    x_padded = jnp.pad(x_up[:, 1:, 1:], ((0, 0), (0, 1), (0, 1)))
    assert x_padded.shape == (CI, hout + KH - 1, wout + KW - 1)

    # Build cols^T = (K, M) directly; K ordered as (kh, kw, ci), spatial last.
    # No large cross-lane transpose is needed in this layout.
    patches = jnp.stack(
        [x_padded[:, kh:kh + hout, kw:kw + wout]
         for kh in range(KH) for kw in range(KW)], axis=0)   # (KH*KW, CI, OH, OW)
    cols_t = patches.reshape(K_RAW, m_raw)
    cols_t = jnp.pad(cols_t, ((0, K_PAD - K_RAW), (0, m_pad - m_raw)))

    # W^T = (CO, K), spatially flipped, same (kh, kw, ci) K ordering.
    w_flip = weight[:, :, ::-1, ::-1]                        # (CI, CO, KH, KW)
    w_t = w_flip.transpose(1, 2, 3, 0).reshape(CO, K_RAW)    # tiny (5, 45)
    w_t = jnp.pad(w_t, ((0, CO_PAD - CO), (0, K_PAD - K_RAW)))

    b2d = jnp.pad(bias.reshape(CO, 1), ((0, CO_PAD - CO), (0, 0)))

    cost = pl.CostEstimate(
        flops=2 * CO_PAD * K_PAD * m_pad,
        transcendentals=0,
        bytes_accessed=4 * (CO_PAD * K_PAD + K_PAD * m_pad
                            + CO_PAD + CO_PAD * m_pad),
    )

    out_mat = pl.pallas_call(
        _convt_gemm_kernel,
        out_shape=jax.ShapeDtypeStruct((CO_PAD, m_pad), jnp.float32),
        grid=(1,),
        in_specs=[pl.BlockSpec((CO_PAD, K_PAD), lambda i: (0, 0)),
                  pl.BlockSpec((K_PAD, m_pad), lambda i: (0, 0)),
                  pl.BlockSpec((CO_PAD, 1), lambda i: (0, 0))],
        out_specs=pl.BlockSpec((CO_PAD, m_pad), lambda i: (0, 0)),
        cost_estimate=cost,
    )(w_t, cols_t, b2d)

    # Output is already (CO, OH*OW): slice padding, reshape to NCHW (no transpose).
    return out_mat[:CO, :m_raw].reshape(CO, hout, wout)[None]


if __name__ == "__main__":
    key = jax.random.PRNGKey(0)
    kx, kw_, kb = jax.random.split(key, 3)

    # Input consistent with the module: x1 = torch.randn(1, 5, 16, 16)
    x1 = jax.random.normal(kx, (1, CI, 16, 16), dtype=jnp.float32)

    # Deterministic parameter init (PyTorch-style uniform bound).
    fan = CI * KH * KW
    bound = 1.0 / (fan ** 0.5)
    weight = jax.random.uniform(kw_, (CI, CO, KH, KW), jnp.float32, -bound, bound)
    bias = jax.random.uniform(kb, (CO,), jnp.float32, -bound, bound)

    fwd = jax.jit(conv_transpose_relu)
    y = fwd(x1, weight, bias)
    y = jax.block_until_ready(y)
    assert y.shape == (1, CO, 29, 29), y.shape
    assert y.dtype == jnp.float32
    assert bool(jnp.all(y >= 0.0))           # ReLU output is non-negative
    print("KERNEL_OK")
</pallas_src>

<mosaic_0001>
module attributes {stable_mosaic.version = 11 : i64} {
  func.func @_convt_gemm_kernel(%arg0: i32, %arg1: memref<8x48xf32, #tpu.memory_space<vmem>>, %arg2: memref<48x896xf32, #tpu.memory_space<vmem>>, %arg3: memref<8x1xf32, #tpu.memory_space<vmem>>, %arg4: memref<8x896xf32, #tpu.memory_space<vmem>>) attributes {dimension_semantics = [#tpu.dimension_semantics<arbitrary>], iteration_bounds = array<i64: 1>, scalar_prefetch = 0 : i64, scratch_operands = 0 : i64, tpu.core_type = #tpu.core_type<tc>, window_params = [{pipeline_mode = #tpu.pipeline_mode<synchronous>, transform_indices = @transform_0, window_bounds = array<i64: 8, 48>}, {pipeline_mode = #tpu.pipeline_mode<synchronous>, transform_indices = @transform_1, window_bounds = array<i64: 48, 896>}, {pipeline_mode = #tpu.pipeline_mode<synchronous>, transform_indices = @transform_2, window_bounds = array<i64: 8, 1>}, {pipeline_mode = #tpu.pipeline_mode<synchronous>, transform_indices = @transform_3, window_bounds = array<i64: 8, 896>}]} {
    %c0 = arith.constant 0 : index
    %c0_0 = arith.constant 0 : index
    %0 = vector.load %arg1[%c0, %c0_0] : memref<8x48xf32, #tpu.memory_space<vmem>>, vector<8x48xf32>
    %c0_1 = arith.constant 0 : index
    %c0_2 = arith.constant 0 : index
    %1 = vector.load %arg2[%c0_1, %c0_2] : memref<48x896xf32, #tpu.memory_space<vmem>>, vector<48x896xf32>
    %cst = arith.constant dense<0.000000e+00> : vector<8x896xf32>
    %2 = tpu.matmul %0, %1, %cst {dimension_numbers = #tpu.dot_dimension_numbers<[1], [0], [0], [1], [0, 0, 1, 1], [], []>} : vector<8x48xf32>, vector<48x896xf32>, vector<8x896xf32> -> vector<8x896xf32>
    %c0_3 = arith.constant 0 : index
    %c0_4 = arith.constant 0 : index
    %3 = vector.load %arg3[%c0_3, %c0_4] : memref<8x1xf32, #tpu.memory_space<vmem>>, vector<8x1xf32>
    %4 = vector.broadcast %3 : vector<8x1xf32> to vector<8x896xf32>
    %5 = arith.addf %2, %4 : vector<8x896xf32>
    %cst_5 = arith.constant 0.000000e+00 : f32
    %6 = vector.broadcast %cst_5 : f32 to vector<8x896xf32>
    %7 = arith.maximumf %5, %6 : vector<8x896xf32>
    %c0_6 = arith.constant 0 : index
    %c0_7 = arith.constant 0 : index
    %8 = vector.load %arg4[%c0_6, %c0_7] : memref<8x896xf32, #tpu.memory_space<vmem>>, vector<8x896xf32>
    tpu.vector_store %arg4[%c0_6, %c0_7], %7 {strides = array<i32>} : memref<8x896xf32, #tpu.memory_space<vmem>>, vector<8x896xf32>,
    return
  }
  func.func @transform_0(%arg0: i32) -> (i32, i32) {
    %c0_i32 = arith.constant 0 : i32
    %c0_i32_0 = arith.constant 0 : i32
    %c0_i32_1 = arith.constant 0 : i32
    return %c0_i32, %c0_i32_0 : i32, i32
  }
  func.func @transform_1(%arg0: i32) -> (i32, i32) {
    %c0_i32 = arith.constant 0 : i32
    %c0_i32_0 = arith.constant 0 : i32
    %c0_i32_1 = arith.constant 0 : i32
    return %c0_i32, %c0_i32_0 : i32, i32
  }
  func.func @transform_2(%arg0: i32) -> (i32, i32) {
    %c0_i32 = arith.constant 0 : i32
    %c0_i32_0 = arith.constant 0 : i32
    %c0_i32_1 = arith.constant 0 : i32
    return %c0_i32, %c0_i32_0 : i32, i32
  }
  func.func @transform_3(%arg0: i32) -> (i32, i32) {
    %c0_i32 = arith.constant 0 : i32
    %c0_i32_0 = arith.constant 0 : i32
    %c0_i32_1 = arith.constant 0 : i32
    return %c0_i32, %c0_i32_0 : i32, i32
  }
}

</mosaic_0001>

<bundles_post_ra>
// kernel: conv_transpose_relu.1
= control target key start
LH: loop header
LB: loop body
LE: loop exit
PB: predicated region body
PF: predicated region fallthrough
CT: control target
= control target key end

     0   :  { %v444_v3 = vmov 0.0   ;;  %v445_v8 = vmov 0   ;;  %vm63_vm0 = vcmask 392192   ;;  %v446_v55 = vmov 0.0|0.0   ;;  %s629_s1 = inlined_call_operand.vmem [shape: f32[48,896], index: 1, kind: input, shape index: {}]   ;;  %s630_s0 = inlined_call_operand.vmem [shape: f32[8,48], index: 0, kind: input, shape index: {}]   ;;  %s631_s2 = inlined_call_operand.vmem [shape: f32[8,1], index: 2, kind: input, shape index: {}]   ;;  %s632_s3 = inlined_call_operand.vmem [shape: f32[8,896], index: 3, kind: output, shape index: {}]  }
   0x1   :  { %v16_v0 = vld [vmem:[%s629_s1 + $0x8] sm:$0xff]  ;;  %v23_v1 = vld [vmem:[%s629_s1 + $0x40] sm:$0xff]  ;;  %v18_v2 = vld [vmem:[%s629_s1 + $0x18] sm:$0xff]  ;;  %131 = vmatprep.mubr.f32.mxu0 %v444_v3  ;;  %202 = vmatprep.mubr.f32.mxu1 %v444_v3  ;;  %vm447_vm1 = vmmov 0  }
   0x2   :  { %v394_v4 = vpack.c.bf16 %v23_v1, %v16_v0  ;;  %v25_v5 = vld [vmem:[%s629_s1 + $0x50] sm:$0xff]  ;;  %v15_v6 = vld [vmem:[%s629_s1] sm:$0xff]  ;;  %v22_v7 = vld [vmem:[%s629_s1 + $0x38] sm:$0xff]  ;;  %443 = vset.pattern.permute.xlu0 %v445_v8 }
   0x3   :  { %v406_v9 = vpack.c.bf16 %v25_v5, %v18_v2  ;;  %v396_v10 = vpack.c.bf16 %v22_v7, %v15_v6  ;;  %v17_v11 = vld [vmem:[%s629_s1 + $0x10] sm:$0xff]  ;;  %v24_v12 = vld [vmem:[%s629_s1 + $0x48] sm:$0xff]  ;;  %v30_v13 = vld [vmem:[%s629_s1 + $0x78] sm:$0xff] }
   0x4   :  { %395 = vmatprep.subr.bf16.mxu0 %v394_v4  ;;  %v408_v14 = vpack.c.bf16 %v24_v12, %v17_v11  ;;  %v37_v15 = vld [vmem:[%s629_s1 + $0xb0] sm:$0xff]  ;;  %v32_v16 = vld [vmem:[%s629_s1 + $0x88] sm:$0xff]  ;;  %v39_v17 = vld [vmem:[%s629_s1 + $0xc0] sm:$0xff] }
   0x5   :  { %407 = vmatprep.subr.bf16.mxu1 %v406_v9  ;;  %397 = vmatpush1.bf16.msra.mxu0 %v396_v10  ;;  %v398_v18 = vpack.c.bf16 %v37_v15, %v30_v13  ;;  %v410_v19 = vpack.c.bf16 %v39_v17, %v32_v16  ;;  %v29_v20 = vld [vmem:[%s629_s1 + $0x70] sm:$0xff]  ;;  %v36_v21 = vld [vmem:[%s629_s1 + $0xa8] sm:$0xff]  ;;  %v31_v22 = vld [vmem:[%s629_s1 + $0x80] sm:$0xff] }
   0x6   :  { %409 = vmatpush1.bf16.msra.mxu1 %v408_v14  ;;  %v400_v23 = vpack.c.bf16 %v36_v21, %v29_v20  ;;  %v38_v24 = vld [vmem:[%s629_s1 + $0xb8] sm:$0xff]  ;;  %v44_v25 = vld [vmem:[%s629_s1 + $0xe8] sm:$0xff]  ;;  %v51_v26 = vld [vmem:[%s629_s1 + $0x120] sm:$0xff] }
   0x7   :  { %399 = vmatprep.subr.bf16.mxu0 %v398_v18  ;;  %411 = vmatprep.subr.bf16.mxu1 %v410_v19  ;;  %v412_v27 = vpack.c.bf16 %v38_v24, %v31_v22  ;;  %v402_v28 = vpack.c.bf16 %v51_v26, %v44_v25  ;;  %v46_v29 = vld [vmem:[%s629_s1 + $0xf8] sm:$0xff]  ;;  %v53_v30 = vld [vmem:[%s629_s1 + $0x130] sm:$0xff]  ;;  %v43_v31 = vld [vmem:[%s629_s1 + $0xe0] sm:$0xff] }
   0x8   :  { %v414_v32 = vpack.c.bf16 %v53_v30, %v46_v29  ;;  %v50_v33 = vld [vmem:[%s629_s1 + $0x118] sm:$0xff]  ;;  %v45_v34 = vld [vmem:[%s629_s1 + $0xf0] sm:$0xff]  ;;  %v52_v35 = vld [vmem:[%s629_s1 + $0x128] sm:$0xff] }
   0x9   :  { %401 = vmatpush1.bf16.msra.mxu0 %v400_v23  ;;  %v404_v36 = vpack.c.bf16 %v50_v33, %v43_v31  ;;  %v20_v37 = vld [vmem:[%s629_s1 + $0x28] sm:$0xff]  ;;  %v27_v38 = vld [vmem:[%s629_s1 + $0x60] sm:$0xff]  ;;  %v416_v39 = vpack.c.bf16 %v52_v35, %v45_v34  ;;  %v26_v42 = vld [vmem:[%s629_s1 + $0x58] sm:$0xff] }
   0xa   :  { %413 = vmatpush1.bf16.msra.mxu1 %v412_v27  ;;  %403 = vmatprep.subr.bf16.mxu0 %v402_v28  ;;  %v418_v40 = vpack.c.bf16 %v27_v38, %v20_v37  ;;  %v19_v41 = vld [vmem:[%s629_s1 + $0x20] sm:$0xff]  ;;  %v21_v43 = vld [vmem:[%s629_s1 + $0x30] sm:$0xff]  ;;  %v28_v44 = vld [vmem:[%s629_s1 + $0x68] sm:$0xff] }
   0xb   :  { %415 = vmatprep.subr.bf16.mxu1 %v414_v32  ;;  %v34_v45 = vld [vmem:[%s629_s1 + $0x98] sm:$0xff]  ;;  %v41_v46 = vld [vmem:[%s629_s1 + $0xd0] sm:$0xff]  ;;  %v14_v47 = vld [vmem:[%s630_s0] sm:$0xff]  ;;  %v420_v48 = vpack.c.bf16 %v26_v42, %v19_v41  ;;  %v431_v50 = vpack.c.bf16 %v28_v44, %v21_v43 }
   0xc   :  { %v33_v49 = vld [vmem:[%s629_s1 + $0x90] sm:$0xff]  ;;  %v422_v51 = vpack.c.bf16 %v41_v46, %v34_v45  ;;  %v40_v52 = vld [vmem:[%s629_s1 + $0xc8] sm:$0xff]  ;;  %v35_v53 = vld [vmem:[%s629_s1 + $0xa0] sm:$0xff] }
   0xd   :  { %405 = vmatpush1.bf16.msra.mxu0 %v404_v36  ;;  %v42_v54 = vld [vmem:[%s629_s1 + $0xd8] sm:$0xff]  ;;  %v48_v56 = vld [vmem:[%s629_s1 + $0x108] sm:$0xff]  ;;  %v55_v57 = vld [vmem:[%s629_s1 + $0x140] sm:$0xff]  ;;  %v424_v59 = vpack.c.bf16 %v40_v52, %v33_v49 }
   0xe   :  { %417 = vmatpush1.bf16.msra.mxu1 %v416_v39  ;;  %419 = vmatprep.subr.bf16.mxu0 %v418_v40  ;;  %v57_v58 = vld [vmem:[%s631_s2] sm:$0xff]  ;;  %v434_v60 = vpack.c.bf16 %v42_v54, %v35_v53  ;;  %v426_v61 = vpack.c.bf16 %v55_v57, %v48_v56  ;;  %v54_v63 = vld [vmem:[%s629_s1 + $0x138] sm:$0xff]  ;;  %v49_v0 = vld [vmem:[%s629_s1 + $0x110] sm:$0xff] }
   0xf   :  { %430 = vmatprep.subr.bf16.mxu1 %v446_v55  ;;  %60 = vperm.xlu0 %443, %v57_v58   ;;  %v47_v62 = vld [vmem:[%s629_s1 + $0x100] sm:$0xff]  ;;  %v56_v1 = vld [vmem:[%s629_s1 + $0x148] sm:$0xff] }
  0x10   :  { %368 = vmatmul.mubr.msk.f32.vlgmr.msra.gmra.mrb[0].mxu0 %vm63_vm0, %v14_v47  ;;  %v428_v2 = vpack.c.bf16 %v54_v63, %v47_v62  ;;  %v437_v4 = vpack.c.bf16 %v56_v1, %v49_v0 }
  0x11   :  { %369 = vmatmul.mubr.msk.f32.vlgmr.msra.gmra.mrb[0].mxu1 %vm63_vm0, %v14_v47  ;;  %421 = vmatpush1.bf16.msra.mxu0 %v420_v48 }
  0x12   :  { %432 = vmatpush3.bf16.msra.mxu1 %v431_v50  ;;  %423 = vmatprep.subr.bf16.mxu0 %v422_v51 }
  0x13   :  { %433 = vmatprep.subr.bf16.mxu1 %v446_v55  ;;  %273 = vmatprep.mubr.f32.mxu0 %v444_v3 }
  0x14   :  { %391 = vmatprep.mubr.msk.f32.mxu1 %vm447_vm1, %v444_v3 }
  0x15   :  { %425 = vmatpush1.bf16.msra.mxu0 %v424_v59 }
  0x16   :  { %435 = vmatpush3.bf16.msra.mxu1 %v434_v60  ;;  %427 = vmatprep.subr.bf16.mxu0 %v426_v61 }
  0x17   :  { %436 = vmatprep.subr.bf16.mxu1 %v446_v55 }
  0x19   :  { %429 = vmatpush1.bf16.msra.mxu0 %v428_v2 }
  0x1a   :  { %438 = vmatpush3.bf16.msra.mxu1 %v437_v4 }
  0x1c   :  { %370 = vmatmul.mubr.msk.f32.vlgmr.msra.gmra.mrb[2].mxu0 %vm63_vm0, %v14_v47 }
  0x1d   :  { %392 = vmatmul.mubr.msk.f32.vlgmr.msra.gmra.mrb[2].mxu1 %vm63_vm0, %v14_v47 }
  0x8e   :  { %v61_v5 = vpop.permute.xlu0 %60 }
  0xe3   :  { %v133_v6 = vpop.f32.mrb[0].mxu0 }
  0xe4   :  { %v134_v7 = vadd.f32 %v133_v6, %v61_v5  ;;  %v135_v8 = vpop.f32.mrb[1].mxu0  ;;  %v204_v9 = vpop.f32.mrb[0].mxu1 }
  0xe5   :  { %v136_v10 = vadd.f32 %v135_v8, %v61_v5  ;;  %v205_v11 = vadd.f32 %v204_v9, %v61_v5  ;;  %v206_v3 = vpop.f32.mrb[1].mxu1 }
  0xe6   :  { %v350_v12 = vmax.f32 %v134_v7, 0.0  ;;  %v207_v13 = vadd.f32 %v206_v3, %v61_v5 }
  0xe7   :  { %v351_v14 = vmax.f32 %v136_v10, 0.0  ;;  %v352_v15 = vmax.f32 %v205_v11, 0.0 }
  0xe8   :  { %357 = vst [vmem:[%s632_s3] sm:$0xff] %v350_v12  ;;  %v353_v16 = vmax.f32 %v207_v13, 0.0 }
  0xe9   :  { %358 = vst [vmem:[%s632_s3 + $0x8] sm:$0xff] %v351_v14  ;;  %359 = vst [vmem:[%s632_s3 + $0x10] sm:$0xff] %v352_v15 }
  0xea   :  { %360 = vst [vmem:[%s632_s3 + $0x18] sm:$0xff] %v353_v16 }
  0xef   :  { %v275_v17 = vpop.f32.mrb[2].mxu0 }
  0xf0   :  { %v276_v18 = vadd.f32 %v275_v17, %v61_v5  ;;  %v346_v19 = vpop.f32.mrb[2].mxu1  ;;  %v277_v20 = vpop.f32.mrb[3].mxu0 }
  0xf1   :  { %v347_v21 = vadd.f32 %v346_v19, %v61_v5  ;;  %v278_v22 = vadd.f32 %v277_v20, %v61_v5  ;;  %v393_v23 = vpop.f32.mrb[3].mxu1 }
  0xf2   :  { %v354_v24 = vmax.f32 %v276_v18, 0.0 }
  0xf3   :  { %v356_v25 = vmax.f32 %v347_v21, 0.0  ;;  %v355_v26 = vmax.f32 %v278_v22, 0.0 }
  0xf4   :  { %361 = vst [vmem:[%s632_s3 + $0x20] sm:$0xff] %v354_v24 }
  0xf5   :  { %363 = vst [vmem:[%s632_s3 + $0x30] sm:$0xff] %v356_v25  ;;  %362 = vst [vmem:[%s632_s3 + $0x28] sm:$0xff] %v355_v26 }

</bundles_post_ra>
